<compile_context>
chip_gen: v5e
topology: v5e:2x2
jax: 0.10.0
libtpu: 0.0.40
codegen_flags: <defaults>
</compile_context>

<pallas_src>
import jax
import jax.numpy as jnp
from jax import lax
from jax.experimental import pallas as pl
from jax.experimental.pallas import tpu as pltpu


def _round_up(x, m):
    return ((x + m - 1) // m) * m


def _fit_tile(extent, align, max_tile):
    """Pick a tile size that is a multiple of `align`, at most `max_tile`, and
    minimizes padding of `extent` up to a multiple of the tile."""
    padded = _round_up(extent, align)
    if padded <= max_tile:
        return padded, padded                      # single block, no extra pad
    n_blocks = pl.cdiv(padded, max_tile)
    tile = _round_up(pl.cdiv(padded, n_blocks), align)
    return tile, tile * n_blocks                   # (tile, padded_extent)


# ----------------------------------------------------------------------------
# Kernels
# ----------------------------------------------------------------------------
def _mapping_kernel_single_k(x_ref, w_ref, o_ref):
    """One (tm, tn) output tile; full K contraction in a single grid step.

    x_ref: (tm, K)   w_ref: (tn, K)  -> o_ref: (tm, tn) = x @ w.T (on the MXU).
    """
    o_ref[...] = lax.dot_general(
        x_ref[...],
        w_ref[...],
        dimension_numbers=(((1,), (1,)), ((), ())),   # contract K with K (transposed RHS)
        preferred_element_type=jnp.float32,
    ).astype(o_ref.dtype)


def _mapping_kernel_multi_k(x_ref, w_ref, o_ref, acc_ref):
    """Accumulating variant for large vocabularies (K split across grid axis 2)."""
    k = pl.program_id(2)

    @pl.when(k == 0)
    def _():
        acc_ref[...] = jnp.zeros_like(acc_ref)

    acc_ref[...] += lax.dot_general(
        x_ref[...],
        w_ref[...],
        dimension_numbers=(((1,), (1,)), ((), ())),
        preferred_element_type=jnp.float32,
    )

    @pl.when(k == pl.num_programs(2) - 1)
    def _():
        o_ref[...] = acc_ref[...].astype(o_ref.dtype)


# ----------------------------------------------------------------------------
# Wrapper
# ----------------------------------------------------------------------------
def mapping_forward(x, weight, *, tm=None, tn=None, tk=None):
    """Equivalent of nn.Linear(vocab_size, embedding_dim, bias=False)(x).

    x:      (..., vocab_size)
    weight: (embedding_dim, vocab_size)   (PyTorch layout; used as-is, no transpose copy)
    returns (..., embedding_dim)
    """
    orig_shape = x.shape
    K = orig_shape[-1]
    N, K2 = weight.shape
    assert K == K2, "vocab_size mismatch between x and weight"

    x2d = x.reshape(-1, K)
    M = x2d.shape[0]
    out_dtype = x2d.dtype

    # --- Tile selection: multiples of (8, 128); fitted to minimize padding ---
    if tm is None:
        tm, Mp = _fit_tile(M, 8, 256)
    else:
        Mp = _round_up(M, tm)
    if tn is None:
        tn, Np = _fit_tile(N, 128, 512)
    else:
        Np = _round_up(N, tn)
    if tk is None:
        tk, Kp = _fit_tile(K, 128, 2048)
    else:
        Kp = _round_up(K, tk)

    xp = x2d if (Mp == M and Kp == K) else jnp.pad(x2d, ((0, Mp - M), (0, Kp - K)))
    wp = weight if (Np == N and Kp == K) else jnp.pad(weight, ((0, Np - N), (0, Kp - K)))

    cost = pl.CostEstimate(
        flops=2 * Mp * Np * Kp,
        transcendentals=0,
        bytes_accessed=(xp.size * xp.dtype.itemsize
                        + wp.size * wp.dtype.itemsize
                        + Mp * Np * jnp.dtype(out_dtype).itemsize),
    )

    n_k = Kp // tk
    if n_k == 1:
        # Single K step: no accumulator scratch, no revisit of the output tile.
        out = pl.pallas_call(
            _mapping_kernel_single_k,
            out_shape=jax.ShapeDtypeStruct((Mp, Np), out_dtype),
            grid_spec=pltpu.PrefetchScalarGridSpec(
                num_scalar_prefetch=0,
                grid=(Mp // tm, Np // tn),
                in_specs=[
                    pl.BlockSpec((tm, Kp), lambda i, j: (i, 0)),   # x tile
                    pl.BlockSpec((tn, Kp), lambda i, j: (j, 0)),   # weight tile (N, K layout)
                ],
                out_specs=pl.BlockSpec((tm, tn), lambda i, j: (i, j)),
            ),
            compiler_params=pltpu.CompilerParams(
                dimension_semantics=("parallel", "parallel"),
                vmem_limit_bytes=64 << 20,
            ),
            cost_estimate=cost,
        )(xp, wp)
    else:
        out = pl.pallas_call(
            _mapping_kernel_multi_k,
            out_shape=jax.ShapeDtypeStruct((Mp, Np), out_dtype),
            grid_spec=pltpu.PrefetchScalarGridSpec(
                num_scalar_prefetch=0,
                grid=(Mp // tm, Np // tn, n_k),
                in_specs=[
                    pl.BlockSpec((tm, tk), lambda i, j, k: (i, k)),
                    pl.BlockSpec((tn, tk), lambda i, j, k: (j, k)),
                ],
                out_specs=pl.BlockSpec((tm, tn), lambda i, j, k: (i, j)),
                scratch_shapes=[pltpu.VMEM((tm, tn), jnp.float32)],
            ),
            compiler_params=pltpu.CompilerParams(
                dimension_semantics=("parallel", "parallel", "arbitrary"),
                vmem_limit_bytes=64 << 20,
            ),
            cost_estimate=cost,
        )(xp, wp)

    if Mp != M or Np != N:
        out = out[:M, :N]
    return out.reshape(*orig_shape[:-1], N)


if __name__ == "__main__":
    # Small shapes consistent with the module's forward (Linear over the vocab dim).
    vocab_size = 256
    embedding_dim = 128
    batch = 16

    key = jax.random.PRNGKey(0)
    kx, kw = jax.random.split(key)

    # Deterministic "parameters" — mimic nn.Linear's kaiming-uniform-ish scale.
    bound = 1.0 / (vocab_size ** 0.5)
    weight = jax.random.uniform(
        kw, (embedding_dim, vocab_size), jnp.float32, minval=-bound, maxval=bound
    )
    x = jax.random.normal(kx, (batch, vocab_size), jnp.float32)

    out = mapping_forward(x, weight)
    out = jax.block_until_ready(out)

    # Reference check against plain JAX (same math as PyTorch F.linear, bias=False).
    ref = x @ weight.T
    assert out.shape == (batch, embedding_dim)
    assert jnp.allclose(out, ref, atol=1e-4, rtol=1e-4)

    # Exercise non-tile-multiple M, a multi-K-step path, and a leading batch dim.
    x2 = jax.random.normal(jax.random.PRNGKey(1), (2, 7, vocab_size), jnp.float32)
    out2 = jax.block_until_ready(mapping_forward(x2, weight, tk=128))
    ref2 = jnp.einsum("bmk,nk->bmn", x2, weight)
    assert out2.shape == (2, 7, embedding_dim)
    assert jnp.allclose(out2, ref2, atol=1e-4, rtol=1e-4)

    print("KERNEL_OK")
</pallas_src>

<mosaic_0001>
module attributes {stable_mosaic.version = 11 : i64} {
  func.func @_mapping_kernel_single_k(%arg0: i32, %arg1: i32, %arg2: memref<16x256xf32, #tpu.memory_space<vmem>>, %arg3: memref<128x256xf32, #tpu.memory_space<vmem>>, %arg4: memref<16x128xf32, #tpu.memory_space<vmem>>) attributes {dimension_semantics = [#tpu.dimension_semantics<parallel>, #tpu.dimension_semantics<parallel>], iteration_bounds = array<i64: 1, 1>, scalar_prefetch = 0 : i64, scratch_operands = 0 : i64, tpu.core_type = #tpu.core_type<tc>, window_params = [{transform_indices = @transform_0, window_bounds = array<i64: 16, 256>}, {transform_indices = @transform_1, window_bounds = array<i64: 128, 256>}, {transform_indices = @transform_2, window_bounds = array<i64: 16, 128>}]} {
    %c0 = arith.constant 0 : index
    %c0_0 = arith.constant 0 : index
    %0 = vector.load %arg2[%c0, %c0_0] : memref<16x256xf32, #tpu.memory_space<vmem>>, vector<16x256xf32>
    %c0_1 = arith.constant 0 : index
    %c0_2 = arith.constant 0 : index
    %1 = vector.load %arg3[%c0_1, %c0_2] : memref<128x256xf32, #tpu.memory_space<vmem>>, vector<128x256xf32>
    %cst = arith.constant dense<0.000000e+00> : vector<16x128xf32>
    %2 = tpu.matmul %0, %1, %cst {dimension_numbers = #tpu.dot_dimension_numbers<[1], [1], [0], [0], [0, 0, 1, 0], [], []>} : vector<16x256xf32>, vector<128x256xf32>, vector<16x128xf32> -> vector<16x128xf32>
    %c0_3 = arith.constant 0 : index
    %c0_4 = arith.constant 0 : index
    %3 = vector.load %arg4[%c0_3, %c0_4] : memref<16x128xf32, #tpu.memory_space<vmem>>, vector<16x128xf32>
    tpu.vector_store %arg4[%c0_3, %c0_4], %2 {strides = array<i32>} : memref<16x128xf32, #tpu.memory_space<vmem>>, vector<16x128xf32>,
    return
  }
  func.func @transform_0(%arg0: i32, %arg1: i32) -> (i32, i32) {
    %c0_i32 = arith.constant 0 : i32
    %c0_i32_0 = arith.constant 0 : i32
    return %arg0, %c0_i32 : i32, i32
  }
  func.func @transform_1(%arg0: i32, %arg1: i32) -> (i32, i32) {
    %c0_i32 = arith.constant 0 : i32
    %c0_i32_0 = arith.constant 0 : i32
    return %arg1, %c0_i32 : i32, i32
  }
  func.func @transform_2(%arg0: i32, %arg1: i32) -> (i32, i32) {
    %c0_i32 = arith.constant 0 : i32
    return %arg0, %arg1 : i32, i32
  }
}

</mosaic_0001>

<bundles_post_ra>
// kernel: tpu_custom_call.1
= control target key start
LH: loop header
LB: loop body
LE: loop exit
PB: predicated region body
PF: predicated region fallthrough
CT: control target
= control target key end

     0   :  { %7 = vsyncpa [#allocation3], 0  ;;  %s296_s0 = inlined_call_operand.hbm [shape: f32[16,256], index: 0, kind: input, shape index: {}]   ;;  %s297_s1 = inlined_call_operand.hbm [shape: f32[128,256], index: 1, kind: input, shape index: {}]   ;;  %s298_s2 = inlined_call_operand.hbm [shape: f32[16,128], index: 2, kind: output, shape index: {}]  }
   0x1   :  { %8 = vsyncpa [#allocation6], 0 }
   0x2   :  { %9 = vsyncpa [#allocation4], 0  ;;  %s14_s11 = sshll.u32 %s296_s0, 4  ;;  %s265_s12 = smov [#allocation2]   ;;  %s15_s11 = int_to_ptr.hbm [resolvable:$true] %s14_s11 }
   0x3   :  { %s16_s13 = sshll.u32 %s265_s12, 4  ;;  %s27_s16 = sshll.u32 %s297_s1, 4  ;;  %s17_s13 = int_to_ptr.vmem [resolvable:$true] %s16_s13  ;;  %s28_s16 = int_to_ptr.hbm [resolvable:$true] %s27_s16 }
   0x4   :  { %s266_s17 = smov 256   ;;  %s267_s18 = smov 16  }
   0x5   :  { %22 = dma.hbm_to_vmem [thread:$0]  %s15_s11, 512, %s17_s13, [#allocation3], %s266_s17, %s266_s17, %s267_s18  }
   0x6   :  { %s268_s19 = smov [#allocation5]  }
   0x7   :  { %s29_s20 = sshll.u32 %s268_s19, 4  ;;  %s30_s20 = int_to_ptr.vmem [resolvable:$true] %s29_s20 }
   0x8   :  { %35 = dma.hbm_to_vmem [thread:$0]  %s28_s16, 4096, %s30_s20, [#allocation6], %s266_s17, %s266_s17, %s267_s18  }
   0x9   :  { %259 = dma.done.wait [#allocation3], 512  }
   0xa   :  { %260 = vsyncadd [#allocation3], 4294966784 }
   0xb   :  { %261 = dma.done.wait [#allocation6], 4096  }
   0xc   :  { %262 = vsyncadd [#allocation6], 4294963200  ;;  %v78_v0 = vld [vmem:[#allocation5 + $0xf0] sm:$0xff]  ;;  %v79_v1 = vld [vmem:[#allocation5 + $0xf8] sm:$0xff]  ;;  %s269_s0 = smov [#allocation7]   ;;  %s134_s23 = sshll.u32 %s298_s2, 4  ;;  %s135_s23 = int_to_ptr.hbm [resolvable:$true] %s134_s23 }
   0xd   :  { %148 = vmatpush.xpose.msra.mxu2 %v78_v0  ;;  %164 = vmatpush.xpose.msra.mxu3 %v79_v1  ;;  %v76_v2 = vld [vmem:[#allocation5 + $0xe0] sm:$0xff]  ;;  %v77_v3 = vld [vmem:[#allocation5 + $0xe8] sm:$0xff]  ;;  %v74_v4 = vld [vmem:[#allocation5 + $0xd0] sm:$0xff]  ;;  %s132_s1 = sshll.u32 %s269_s0, 4  ;;  %s270_s24 = smov 128   ;;  %s133_s1 = int_to_ptr.vmem [resolvable:$true] %s132_s1 }
   0xe   :  { %80 = vmatpush.xpose.msra.mxu0 %v78_v0  ;;  %103 = vmatpush.xpose.msra.mxu1 %v79_v1  ;;  %v75_v5 = vld [vmem:[#allocation5 + $0xd8] sm:$0xff]  ;;  %v72_v6 = vld [vmem:[#allocation5 + $0xc0] sm:$0xff]  ;;  %v73_v7 = vld [vmem:[#allocation5 + $0xc8] sm:$0xff]  ;;  %s271_s25 = smov 8  }
   0xf   :  { %v70_v8 = vld [vmem:[#allocation5 + $0xb0] sm:$0xff]  ;;  %v71_v9 = vld [vmem:[#allocation5 + $0xb8] sm:$0xff]  ;;  %v68_v10 = vld [vmem:[#allocation5 + $0xa0] sm:$0xff] }
  0x10   :  { %v69_v11 = vld [vmem:[#allocation5 + $0xa8] sm:$0xff]  ;;  %v66_v12 = vld [vmem:[#allocation5 + $0x90] sm:$0xff]  ;;  %v67_v13 = vld [vmem:[#allocation5 + $0x98] sm:$0xff] }
  0x11   :  { %149 = vmatpush.xpose.msra.mxu2 %v76_v2  ;;  %165 = vmatpush.xpose.msra.mxu3 %v77_v3  ;;  %v64_v14 = vld [vmem:[#allocation5 + $0x80] sm:$0xff]  ;;  %v65_v15 = vld [vmem:[#allocation5 + $0x88] sm:$0xff]  ;;  %v62_v16 = vld [vmem:[#allocation5 + $0x70] sm:$0xff] }
  0x12   :  { %81 = vmatpush.xpose.msra.mxu0 %v76_v2  ;;  %104 = vmatpush.xpose.msra.mxu1 %v77_v3  ;;  %v63_v17 = vld [vmem:[#allocation5 + $0x78] sm:$0xff]  ;;  %v60_v18 = vld [vmem:[#allocation5 + $0x60] sm:$0xff]  ;;  %v61_v19 = vld [vmem:[#allocation5 + $0x68] sm:$0xff] }
  0x13   :  { %v58_v20 = vld [vmem:[#allocation5 + $0x50] sm:$0xff]  ;;  %v59_v21 = vld [vmem:[#allocation5 + $0x58] sm:$0xff]  ;;  %v56_v22 = vld [vmem:[#allocation5 + $0x40] sm:$0xff] }
  0x14   :  { %v57_v23 = vld [vmem:[#allocation5 + $0x48] sm:$0xff]  ;;  %v54_v24 = vld [vmem:[#allocation5 + $0x30] sm:$0xff]  ;;  %v55_v25 = vld [vmem:[#allocation5 + $0x38] sm:$0xff] }
  0x15   :  { %150 = vmatpush.xpose.msra.mxu2 %v74_v4  ;;  %166 = vmatpush.xpose.msra.mxu3 %v75_v5  ;;  %v52_v26 = vld [vmem:[#allocation5 + $0x20] sm:$0xff]  ;;  %v53_v27 = vld [vmem:[#allocation5 + $0x28] sm:$0xff]  ;;  %v50_v28 = vld [vmem:[#allocation5 + $0x10] sm:$0xff] }
  0x16   :  { %82 = vmatpush.xpose.msra.mxu0 %v74_v4  ;;  %105 = vmatpush.xpose.msra.mxu1 %v75_v5  ;;  %v51_v29 = vld [vmem:[#allocation5 + $0x18] sm:$0xff]  ;;  %v48_v30 = vld [vmem:[#allocation5] sm:$0xff]  ;;  %v49_v31 = vld [vmem:[#allocation5 + $0x8] sm:$0xff] }
  0x17   :  { %v46_v32 = vld [vmem:[#allocation2 + $0x10] sm:$0xff]  ;;  %v47_v33 = vld [vmem:[#allocation2 + $0x18] sm:$0xff]  ;;  %v44_v34 = vld [vmem:[#allocation2] sm:$0xff] }
  0x18   :  { %v45_v35 = vld [vmem:[#allocation2 + $0x8] sm:$0xff] }
  0x19   :  { %151 = vmatpush.xpose.msra.mxu2 %v72_v6  ;;  %167 = vmatpush.xpose.msra.mxu3 %v73_v7 }
  0x1a   :  { %83 = vmatpush.xpose.msra.mxu0 %v72_v6  ;;  %106 = vmatpush.xpose.msra.mxu1 %v73_v7 }
  0x1d   :  { %152 = vmatpush.xpose.msra.mxu2 %v70_v8  ;;  %168 = vmatpush.xpose.msra.mxu3 %v71_v9 }
  0x1e   :  { %84 = vmatpush.xpose.msra.mxu0 %v70_v8  ;;  %107 = vmatpush.xpose.msra.mxu1 %v71_v9 }
  0x21   :  { %153 = vmatpush.xpose.msra.mxu2 %v68_v10  ;;  %169 = vmatpush.xpose.msra.mxu3 %v69_v11 }
  0x22   :  { %85 = vmatpush.xpose.msra.mxu0 %v68_v10  ;;  %108 = vmatpush.xpose.msra.mxu1 %v69_v11 }
  0x25   :  { %154 = vmatpush.xpose.msra.mxu2 %v66_v12  ;;  %170 = vmatpush.xpose.msra.mxu3 %v67_v13 }
  0x26   :  { %86 = vmatpush.xpose.msra.mxu0 %v66_v12  ;;  %109 = vmatpush.xpose.msra.mxu1 %v67_v13 }
  0x29   :  { %155 = vmatpush.xpose.msra.mxu2 %v64_v14  ;;  %171 = vmatpush.xpose.msra.mxu3 %v65_v15 }
  0x2a   :  { %87 = vmatpush.xpose.msra.mxu0 %v64_v14  ;;  %110 = vmatpush.xpose.msra.mxu1 %v65_v15 }
  0x2d   :  { %156 = vmatpush.xpose.msra.mxu2 %v62_v16  ;;  %172 = vmatpush.xpose.msra.mxu3 %v63_v17 }
  0x2e   :  { %88 = vmatpush.xpose.msra.mxu0 %v62_v16  ;;  %111 = vmatpush.xpose.msra.mxu1 %v63_v17 }
  0x31   :  { %157 = vmatpush.xpose.msra.mxu2 %v60_v18  ;;  %173 = vmatpush.xpose.msra.mxu3 %v61_v19 }
  0x32   :  { %89 = vmatpush.xpose.msra.mxu0 %v60_v18  ;;  %112 = vmatpush.xpose.msra.mxu1 %v61_v19 }
  0x35   :  { %158 = vmatpush.xpose.msra.mxu2 %v58_v20  ;;  %174 = vmatpush.xpose.msra.mxu3 %v59_v21 }
  0x36   :  { %90 = vmatpush.xpose.msra.mxu0 %v58_v20  ;;  %113 = vmatpush.xpose.msra.mxu1 %v59_v21 }
  0x39   :  { %159 = vmatpush.xpose.msra.mxu2 %v56_v22  ;;  %175 = vmatpush.xpose.msra.mxu3 %v57_v23 }
  0x3a   :  { %91 = vmatpush.xpose.msra.mxu0 %v56_v22  ;;  %114 = vmatpush.xpose.msra.mxu1 %v57_v23 }
  0x3d   :  { %160 = vmatpush.xpose.msra.mxu2 %v54_v24  ;;  %176 = vmatpush.xpose.msra.mxu3 %v55_v25 }
  0x3e   :  { %92 = vmatpush.xpose.msra.mxu0 %v54_v24  ;;  %115 = vmatpush.xpose.msra.mxu1 %v55_v25 }
  0x41   :  { %161 = vmatpush.xpose.msra.mxu2 %v52_v26  ;;  %177 = vmatpush.xpose.msra.mxu3 %v53_v27 }
  0x42   :  { %93 = vmatpush.xpose.msra.mxu0 %v52_v26  ;;  %116 = vmatpush.xpose.msra.mxu1 %v53_v27 }
  0x45   :  { %162 = vmatpush.xpose.msra.mxu2 %v50_v28  ;;  %178 = vmatpush.xpose.msra.mxu3 %v51_v29 }
  0x46   :  { %94 = vmatpush.xpose.msra.mxu0 %v50_v28  ;;  %117 = vmatpush.xpose.msra.mxu1 %v51_v29 }
  0x49   :  { %163 = vmatpush.xpose.msra.mxu2 %v48_v30  ;;  %179 = vmatpush.xpose.msra.mxu3 %v49_v31 }
  0x4a   :  { %95 = vmatpush.xpose.msra.mxu0 %v48_v30  ;;  %118 = vmatpush.xpose.msra.mxu1 %v49_v31 }
  0x4c   :  { %99 = vmatmul.f32.vlgmr.msra.gmra.mxu2 %v46_v32  ;;  %122 = vmatmul.f32.vlgmr.msra.gmra.mxu3 %v47_v33 }
  0x4d   :  { %96 = vmatmul.f32.vlgmr.msra.gmra.mxu0 %v44_v34  ;;  %119 = vmatmul.f32.vlgmr.msra.gmra.mxu1 %v45_v35 }
  0xca   :  { %v97_v36 = vpop.f32.mrf.mxu0  ;;  %v120_v37 = vpop.f32.mrf.mxu1 }
  0xcb   :  { %v121_v38 = vadd.f32 %v120_v37, %v97_v36 }
  0xcd   :  { %126 = vst [vmem:[#allocation7] sm:$0xff] %v121_v38 }
  0xcf   :  { %v100_v39 = vpop.f32.mrf.mxu2  ;;  %v123_v40 = vpop.f32.mrf.mxu3 }
  0xd0   :  { %v124_v41 = vadd.f32 %v123_v40, %v100_v39 }
  0xd2   :  { %127 = vst [vmem:[#allocation7 + $0x8] sm:$0xff] %v124_v41 }
  0xd3   :  { %140 = dma.vmem_to_hbm [thread:$0]  %s133_s1, 256, %s135_s23, [#allocation4], %s270_s24, %s270_s24, %s271_s25  }
  0xd4   :  { %263 = dma.done.wait [#allocation4], 256  }
  0xd5   :  { %264 = vsyncadd [#allocation4], 4294967040 }
  0xd6   :  { %145 = vsyncpa [#allocation3], 1 }
  0xd7   :  { %146 = vsyncpa [#allocation6], 1 }
  0xd8   :  { %147 = vsyncpa [#allocation4], 1 }

</bundles_post_ra>
